<compile_context>
chip_gen: v5e
topology: v5e:2x2
jax: 0.10.0
libtpu: 0.0.40
codegen_flags: <defaults>
</compile_context>

<pallas_src>
import math
import numpy as np
import jax
import jax.numpy as jnp
from jax.experimental import pallas as pl
from jax.experimental.pallas import tpu as pltpu


def _make_attention_kernel(B, N, H, D, scale):
    C = H * D
    BN = B * N
    R = H * BN  # packed rows, order (h, b, n)

    def kernel(xb_ref, wq_ref, wk_ref, wv_ref, wp_ref, bp_ref,
               cmask_ref, nmask_ref, out_ref, p_ref):
        xb = xb_ref[...]                                                     # (R, C)

        # ---- QKV projections: 128-sublane-row, 64-deep, 64-lane MXU matmuls ----
        q = jnp.dot(xb, wq_ref[...], preferred_element_type=jnp.float32)    # (R, C)
        k = jnp.dot(xb, wk_ref[...], preferred_element_type=jnp.float32)    # (R, C)
        v = jnp.dot(xb, wv_ref[...], preferred_element_type=jnp.float32)    # (R, C)

        # Head split = elementwise channel mask per row-group (no transposes).
        cm = cmask_ref[...]                                                  # (R, C) {0,1}
        k_m = k * cm
        v_m = v * cm

        # ---- single packed 128x128 score matmul + block-diag masked softmax ----
        s = jnp.einsum('rc,sc->rs', q, k_m,
                       preferred_element_type=jnp.float32) * scale          # (R, R)
        s = s + nmask_ref[...]                       # 0 on-block, -1e30 off-block
        s = s - jnp.max(s, axis=-1, keepdims=True)   # full 128-lane reduction
        p = jnp.exp(s)                                # off-block -> exactly 0
        denom = jnp.sum(p, axis=-1, keepdims=True)
        # exact reciprocal: approx=True (EUP) can exceed the 1e-5 attn tolerance
        p = p * pl.reciprocal(denom, approx=False)
        p_ref[...] = p.astype(p_ref.dtype)            # lane-dense (128,128) store

        # ---- P @ (masked V @ Wproj), then reduce the H row groups ----
        vw = jnp.dot(v_m, wp_ref[...], preferred_element_type=jnp.float32)  # (R, C)
        z = jnp.dot(p, vw, preferred_element_type=jnp.float32)              # (R, C)
        # head concat == sum of per-head projected contributions (7 vector adds)
        y = bp_ref[...]                                                      # (1, C)
        for h in range(H):
            y = y + z[h * BN:(h + 1) * BN, :]
        out_ref[...] = y.astype(out_ref.dtype)                               # (BN, C)

    return kernel


def attention_pallas(x, w_qkv, w_proj, b_proj, *, num_heads, scale):
    """x: (B, N, C); w_qkv: (3C, C) [torch Linear layout]; w_proj: (C, C); b_proj: (C,).
    Returns (out (B, N, C), attn (B, num_heads, N, N))."""
    B, N, C = x.shape
    H = num_heads
    D = C // H
    BN = B * N
    R = H * BN
    HB = H * B

    # ---- wrapper-side layout plumbing (free): weight split/transpose, token
    #      replication across head groups, per-group masks ----
    wq_t = w_qkv[0 * C:1 * C, :].T                 # (C, C)
    wk_t = w_qkv[1 * C:2 * C, :].T                 # (C, C)
    wv_t = w_qkv[2 * C:3 * C, :].T                 # (C, C)
    wp_t = w_proj.T                                # (C, C)
    bp = b_proj.reshape(1, C).astype(jnp.float32)  # (1, C)

    x2d = x.reshape(BN, C)
    # packed rows: r = h*(B*N) + b*N + n  ->  token (b, n) replicated per head h
    xb = jnp.broadcast_to(x2d[None, :, :], (H, BN, C)).reshape(R, C)

    rows = jnp.arange(R)
    cols = jnp.arange(C)
    # channel-selection mask: row group h keeps channels [h*D, (h+1)*D)
    cmask = (rows[:, None] // BN == cols[None, :] // D).astype(jnp.float32)   # (R, C)
    # block-diagonal additive mask over (h, b) groups of N rows
    grp = rows // N                                                           # h*B + b
    nmask = jnp.where(grp[:, None] == grp[None, :], 0.0, -1e30).astype(jnp.float32)

    kernel = _make_attention_kernel(B, N, H, D, scale)
    vmem = pl.BlockSpec(memory_space=pltpu.MemorySpace.VMEM)

    out2d, p_full = pl.pallas_call(
        kernel,
        out_shape=(
            jax.ShapeDtypeStruct((BN, C), x.dtype),
            jax.ShapeDtypeStruct((R, R), jnp.float32),
        ),
        in_specs=[vmem] * 8,
        out_specs=(vmem, vmem),
    )(xb, wq_t, wk_t, wv_t, wp_t, bp, cmask, nmask)

    # extract the block diagonal of the packed attention matrix (wrapper-side)
    Pr = p_full.reshape(HB, N, HB, N)
    idx = jnp.arange(HB)
    attn_g = Pr[idx, :, idx, :]                                  # (HB, N, N), g = h*B + b
    attn = attn_g.reshape(H, B, N, N).transpose(1, 0, 2, 3).astype(x.dtype)

    return out2d.reshape(B, N, C), attn


def attention_reference(x, w_qkv, w_proj, b_proj, *, num_heads, scale):
    """Pure-JAX mirror of the PyTorch forward (dropout p=0 -> identity)."""
    B, N, C = x.shape
    D = C // num_heads
    qkv = x @ w_qkv.T                                          # (B, N, 3C)
    qkv = qkv.reshape(B, N, 3, num_heads, D).transpose(2, 0, 3, 1, 4)
    q, k, v = qkv[0], qkv[1], qkv[2]                           # (B, H, N, D)
    attn = jnp.einsum('bhnd,bhmd->bhnm', q, k) * scale
    attn = jax.nn.softmax(attn, axis=-1)
    o = jnp.einsum('bhnm,bhmd->bhnd', attn, v)                 # (B, H, N, D)
    o = o.transpose(0, 2, 1, 3).reshape(B, N, C)
    y = o @ w_proj.T + b_proj
    return y, attn


if __name__ == "__main__":
    # Module config consistent with the forward: dim=64, num_heads=8 -> head_dim=8
    B, N, C = 2, 8, 64
    num_heads = 8
    head_dim = C // num_heads
    scale = head_dim ** (-0.5)

    key = jax.random.PRNGKey(0)
    kx, kqkv, kp, kbp = jax.random.split(key, 4)

    x = jax.random.normal(kx, (B, N, C), dtype=jnp.float32)

    # nn.Linear(dim, dim*3, bias=False): weight (3C, C)
    w_qkv = jax.random.normal(kqkv, (3 * C, C), dtype=jnp.float32) * (1.0 / math.sqrt(C))
    # nn.Linear(dim, dim): weight (C, C), bias (C,)
    w_proj = jax.random.normal(kp, (C, C), dtype=jnp.float32) * (1.0 / math.sqrt(C))
    b_proj = jax.random.normal(kbp, (C,), dtype=jnp.float32) * 0.1

    out, attn = attention_pallas(x, w_qkv, w_proj, b_proj,
                                 num_heads=num_heads, scale=scale)
    out = jax.block_until_ready(out)
    attn = jax.block_until_ready(attn)

    ref_out, ref_attn = attention_reference(x, w_qkv, w_proj, b_proj,
                                            num_heads=num_heads, scale=scale)
    np.testing.assert_allclose(np.asarray(out), np.asarray(ref_out),
                               rtol=1e-4, atol=1e-4)
    np.testing.assert_allclose(np.asarray(attn), np.asarray(ref_attn),
                               rtol=1e-4, atol=1e-5)

    # attn_drop / proj_drop have p=0.0 (identity in this forward) -> no-op.
    print("KERNEL_OK")
</pallas_src>

<mosaic_0001>
module attributes {stable_mosaic.version = 11 : i64} {
  func.func @kernel(%arg0: memref<128x64xf32, #tpu.memory_space<vmem>>, %arg1: memref<64x64xf32, #tpu.memory_space<vmem>>, %arg2: memref<64x64xf32, #tpu.memory_space<vmem>>, %arg3: memref<64x64xf32, #tpu.memory_space<vmem>>, %arg4: memref<64x64xf32, #tpu.memory_space<vmem>>, %arg5: memref<1x64xf32, #tpu.memory_space<vmem>>, %arg6: memref<128x64xf32, #tpu.memory_space<vmem>>, %arg7: memref<128x128xf32, #tpu.memory_space<vmem>>, %arg8: memref<16x64xf32, #tpu.memory_space<vmem>>, %arg9: memref<128x128xf32, #tpu.memory_space<vmem>>) attributes {dimension_semantics = [], scalar_prefetch = 0 : i64, scratch_operands = 0 : i64, tpu.core_type = #tpu.core_type<tc>} {
    %c0 = arith.constant 0 : index
    %c0_0 = arith.constant 0 : index
    %0 = vector.load %arg0[%c0, %c0_0] : memref<128x64xf32, #tpu.memory_space<vmem>>, vector<128x64xf32>
    %c0_1 = arith.constant 0 : index
    %c0_2 = arith.constant 0 : index
    %1 = vector.load %arg1[%c0_1, %c0_2] : memref<64x64xf32, #tpu.memory_space<vmem>>, vector<64x64xf32>
    %cst = arith.constant dense<0.000000e+00> : vector<128x64xf32>
    %2 = tpu.matmul %0, %1, %cst {dimension_numbers = #tpu.dot_dimension_numbers<[1], [0], [0], [1], [0, 0, 1, 1], [], []>} : vector<128x64xf32>, vector<64x64xf32>, vector<128x64xf32> -> vector<128x64xf32>
    %c0_3 = arith.constant 0 : index
    %c0_4 = arith.constant 0 : index
    %3 = vector.load %arg2[%c0_3, %c0_4] : memref<64x64xf32, #tpu.memory_space<vmem>>, vector<64x64xf32>
    %cst_5 = arith.constant dense<0.000000e+00> : vector<128x64xf32>
    %4 = tpu.matmul %0, %3, %cst_5 {dimension_numbers = #tpu.dot_dimension_numbers<[1], [0], [0], [1], [0, 0, 1, 1], [], []>} : vector<128x64xf32>, vector<64x64xf32>, vector<128x64xf32> -> vector<128x64xf32>
    %c0_6 = arith.constant 0 : index
    %c0_7 = arith.constant 0 : index
    %5 = vector.load %arg3[%c0_6, %c0_7] : memref<64x64xf32, #tpu.memory_space<vmem>>, vector<64x64xf32>
    %cst_8 = arith.constant dense<0.000000e+00> : vector<128x64xf32>
    %6 = tpu.matmul %0, %5, %cst_8 {dimension_numbers = #tpu.dot_dimension_numbers<[1], [0], [0], [1], [0, 0, 1, 1], [], []>} : vector<128x64xf32>, vector<64x64xf32>, vector<128x64xf32> -> vector<128x64xf32>
    %c0_9 = arith.constant 0 : index
    %c0_10 = arith.constant 0 : index
    %7 = vector.load %arg6[%c0_9, %c0_10] : memref<128x64xf32, #tpu.memory_space<vmem>>, vector<128x64xf32>
    %8 = arith.mulf %4, %7 : vector<128x64xf32>
    %9 = arith.mulf %6, %7 : vector<128x64xf32>
    "tpu.trace_start"() <{level = 10 : i32, message = "rc,sc->rs"}> : () -> ()
    %cst_11 = arith.constant dense<0.000000e+00> : vector<128x128xf32>
    %10 = tpu.matmul %2, %8, %cst_11 {dimension_numbers = #tpu.dot_dimension_numbers<[1], [1], [0], [0], [0, 0, 1, 0], [], []>} : vector<128x64xf32>, vector<128x64xf32>, vector<128x128xf32> -> vector<128x128xf32>
    "tpu.trace_stop"() : () -> ()
    %cst_12 = arith.constant 0.353553385 : f32
    %11 = vector.broadcast %cst_12 : f32 to vector<128x128xf32>
    %12 = arith.mulf %10, %11 : vector<128x128xf32>
    %c0_13 = arith.constant 0 : index
    %c0_14 = arith.constant 0 : index
    %13 = vector.load %arg7[%c0_13, %c0_14] : memref<128x128xf32, #tpu.memory_space<vmem>>, vector<128x128xf32>
    %14 = arith.addf %12, %13 : vector<128x128xf32>
    %cst_15 = arith.constant dense<0xFF800000> : vector<128xf32>
    %15 = vector.multi_reduction <maximumf>, %14, %cst_15 [1] : vector<128x128xf32> to vector<128xf32>
    %16 = vector.shape_cast %15 : vector<128xf32> to vector<128x1xf32>
    %17 = vector.broadcast %16 : vector<128x1xf32> to vector<128x128xf32>
    %18 = arith.subf %14, %17 : vector<128x128xf32>
    %19 = math.exp %18 : vector<128x128xf32>
    %cst_16 = arith.constant dense<0.000000e+00> : vector<128xf32>
    %20 = vector.multi_reduction <add>, %19, %cst_16 [1] : vector<128x128xf32> to vector<128xf32>
    %21 = vector.shape_cast %20 : vector<128xf32> to vector<128x1xf32>
    %22 = tpu.reciprocal %21 : vector<128x1xf32> -> vector<128x1xf32>
    %23 = vector.broadcast %22 : vector<128x1xf32> to vector<128x128xf32>
    %24 = arith.mulf %19, %23 : vector<128x128xf32>
    %c0_17 = arith.constant 0 : index
    %c0_18 = arith.constant 0 : index
    %25 = vector.load %arg9[%c0_17, %c0_18] : memref<128x128xf32, #tpu.memory_space<vmem>>, vector<128x128xf32>
    tpu.vector_store %arg9[%c0_17, %c0_18], %24 {strides = array<i32>} : memref<128x128xf32, #tpu.memory_space<vmem>>, vector<128x128xf32>,
    %c0_19 = arith.constant 0 : index
    %c0_20 = arith.constant 0 : index
    %26 = vector.load %arg4[%c0_19, %c0_20] : memref<64x64xf32, #tpu.memory_space<vmem>>, vector<64x64xf32>
    %cst_21 = arith.constant dense<0.000000e+00> : vector<128x64xf32>
    %27 = tpu.matmul %9, %26, %cst_21 {dimension_numbers = #tpu.dot_dimension_numbers<[1], [0], [0], [1], [0, 0, 1, 1], [], []>} : vector<128x64xf32>, vector<64x64xf32>, vector<128x64xf32> -> vector<128x64xf32>
    %cst_22 = arith.constant dense<0.000000e+00> : vector<128x64xf32>
    %28 = tpu.matmul %24, %27, %cst_22 {dimension_numbers = #tpu.dot_dimension_numbers<[1], [0], [0], [1], [0, 0, 1, 1], [], []>} : vector<128x128xf32>, vector<128x64xf32>, vector<128x64xf32> -> vector<128x64xf32>
    %c0_23 = arith.constant 0 : index
    %c0_24 = arith.constant 0 : index
    %29 = vector.load %arg5[%c0_23, %c0_24] : memref<1x64xf32, #tpu.memory_space<vmem>>, vector<1x64xf32>
    %30 = vector.extract_strided_slice %28 {offsets = [0, 0], sizes = [16, 64], strides = [1, 1]} : vector<128x64xf32> to vector<16x64xf32>
    %31 = vector.broadcast %29 : vector<1x64xf32> to vector<16x64xf32>
    %32 = arith.addf %31, %30 : vector<16x64xf32>
    %33 = vector.extract_strided_slice %28 {offsets = [16, 0], sizes = [16, 64], strides = [1, 1]} : vector<128x64xf32> to vector<16x64xf32>
    %34 = arith.addf %32, %33 : vector<16x64xf32>
    %35 = vector.extract_strided_slice %28 {offsets = [32, 0], sizes = [16, 64], strides = [1, 1]} : vector<128x64xf32> to vector<16x64xf32>
    %36 = arith.addf %34, %35 : vector<16x64xf32>
    %37 = vector.extract_strided_slice %28 {offsets = [48, 0], sizes = [16, 64], strides = [1, 1]} : vector<128x64xf32> to vector<16x64xf32>
    %38 = arith.addf %36, %37 : vector<16x64xf32>
    %39 = vector.extract_strided_slice %28 {offsets = [64, 0], sizes = [16, 64], strides = [1, 1]} : vector<128x64xf32> to vector<16x64xf32>
    %40 = arith.addf %38, %39 : vector<16x64xf32>
    %41 = vector.extract_strided_slice %28 {offsets = [80, 0], sizes = [16, 64], strides = [1, 1]} : vector<128x64xf32> to vector<16x64xf32>
    %42 = arith.addf %40, %41 : vector<16x64xf32>
    %43 = vector.extract_strided_slice %28 {offsets = [96, 0], sizes = [16, 64], strides = [1, 1]} : vector<128x64xf32> to vector<16x64xf32>
    %44 = arith.addf %42, %43 : vector<16x64xf32>
    %45 = vector.extract_strided_slice %28 {offsets = [112, 0], sizes = [16, 64], strides = [1, 1]} : vector<128x64xf32> to vector<16x64xf32>
    %46 = arith.addf %44, %45 : vector<16x64xf32>
    %c0_25 = arith.constant 0 : index
    %c0_26 = arith.constant 0 : index
    %47 = vector.load %arg8[%c0_25, %c0_26] : memref<16x64xf32, #tpu.memory_space<vmem>>, vector<16x64xf32>
    tpu.vector_store %arg8[%c0_25, %c0_26], %46 {strides = array<i32>} : memref<16x64xf32, #tpu.memory_space<vmem>>, vector<16x64xf32>,
    return
  }
}

</mosaic_0001>

<bundles_post_ra>
// kernel: tpu_custom_call.1
= control target key start
LH: loop header
LB: loop body
LE: loop exit
PB: predicated region body
PF: predicated region fallthrough
CT: control target
= control target key end

     0   :  { %15 = vsyncpa [#allocation3], 0  ;;  %s2120_s0 = inlined_call_operand.vmem [shape: f32[128,64], index: 0, kind: input, shape index: {}]   ;;  %s2121_s1 = inlined_call_operand.vmem [shape: f32[64,64], index: 1, kind: input, shape index: {}]   ;;  %s2122_s2 = inlined_call_operand.vmem [shape: f32[64,64], index: 2, kind: input, shape index: {}]   ;;  %s2123_s3 = inlined_call_operand.vmem [shape: f32[64,64], index: 3, kind: input, shape index: {}]   ;;  %s2124_s4 = inlined_call_operand.hbm [shape: f32[64,64], index: 4, kind: input, shape index: {}]   ;;  %s2125_s5 = inlined_call_operand.vmem [shape: f32[1,64], index: 5, kind: input, shape index: {}]   ;;  %s2126_s6 = inlined_call_operand.vmem [shape: f32[128,64], index: 6, kind: input, shape index: {}]   ;;  %s2127_s7 = inlined_call_operand.vmem [shape: f32[128,128], index: 7, kind: input, shape index: {}]   ;;  %s2128_s8 = inlined_call_operand.hbm [shape: f32[16,64], index: 8, kind: output, shape index: {0}]   ;;  %s2129_s9 = inlined_call_operand.hbm [shape: f32[128,128], index: 9, kind: output, shape index: {1}]  }
   0x1   :  { %16 = vsyncpa [#allocation4], 0 }
   0x2   :  { %17 = vsyncpa [#allocation7], 0  ;;  %s30_s11 = sshll.u32 %s2124_s4, 4  ;;  %s1471_s12 = smov [#allocation2]   ;;  %s31_s11 = int_to_ptr.hbm [resolvable:$true] %s30_s11 }
   0x3   :  { %s32_s13 = sshll.u32 %s1471_s12, 4  ;;  %s1472_s14 = smov 128   ;;  %s33_s13 = int_to_ptr.vmem [resolvable:$true] %s32_s13 }
   0x4   :  { %s1473_s15 = smov 8  }
   0x5   :  { %38 = dma.hbm_to_vmem [thread:$0]  %s31_s11, 1024, %s33_s13, [#allocation3], %s1472_s14, %s1472_s14, %s1473_s15  }
   0x6   :  { %1465 = dma.done.wait [#allocation3], 1024  }
   0x7   :  { %1466 = vsyncadd [#allocation3], 4294966272  ;;  %v194_v0 = vld [vmem:[%s2122_s2 + $0x38] sm:$0xff]  ;;  %v193_v1 = vld [vmem:[%s2122_s2 + $0x30] sm:$0xff]  ;;  %vm73_vm0 = vcmask 523264  }
   0x8   :  { %203 = vmatpush.msra.mxu1 %v194_v0  ;;  %1307 = vmatpush.msra.mxu2 %v194_v0  ;;  %v192_v2 = vld [vmem:[%s2122_s2 + $0x28] sm:$0xff]  ;;  %v191_v3 = vld [vmem:[%s2122_s2 + $0x20] sm:$0xff]  ;;  %v190_v4 = vld [vmem:[%s2122_s2 + $0x18] sm:$0xff] }
   0x9   :  { %v189_v5 = vld [vmem:[%s2122_s2 + $0x10] sm:$0xff]  ;;  %v188_v6 = vld [vmem:[%s2122_s2 + $0x8] sm:$0xff]  ;;  %v187_v7 = vld [vmem:[%s2122_s2] sm:$0xff] }
   0xa   :  { %204 = vmatpush.msra.mxu1 %v193_v1  ;;  %1308 = vmatpush.msra.mxu2 %v193_v1  ;;  %v1559_v8 = vld [vmem:[%s2120_s0] sm:$0xff]  ;;  %v1564_v9 = vld [vmem:[%s2120_s0 + $0x50] sm:$0xff]  ;;  %v1573_v10 = vld [vmem:[%s2120_s0 + $0x8] sm:$0xff] }
   0xb   :  { %v1578_v11 = vld [vmem:[%s2120_s0 + $0x58] sm:$0xff]  ;;  %v1587_v12 = vld [vmem:[%s2120_s0 + $0x10] sm:$0xff]  ;;  %v1592_v13 = vld [vmem:[%s2120_s0 + $0x60] sm:$0xff] }
   0xc   :  { %205 = vmatpush.msra.mxu1 %v192_v2  ;;  %1309 = vmatpush.msra.mxu2 %v192_v2  ;;  %v1601_v14 = vld [vmem:[%s2120_s0 + $0x18] sm:$0xff]  ;;  %v1606_v15 = vld [vmem:[%s2120_s0 + $0x68] sm:$0xff]  ;;  %v1615_v16 = vld [vmem:[%s2120_s0 + $0x20] sm:$0xff] }
   0xd   :  { %v1620_v17 = vld [vmem:[%s2120_s0 + $0x70] sm:$0xff]  ;;  %v267_v18 = vld [vmem:[%s2123_s3 + $0x38] sm:$0xff]  ;;  %v1632_v19 = vld [vmem:[%s2120_s0 + $0x28] sm:$0xff] }
   0xe   :  { %206 = vmatpush.msra.mxu1 %v191_v3  ;;  %1310 = vmatpush.msra.mxu2 %v191_v3  ;;  %v1637_v20 = vld [vmem:[%s2120_s0 + $0x78] sm:$0xff]  ;;  %v266_v21 = vld [vmem:[%s2123_s3 + $0x30] sm:$0xff]  ;;  %v265_v22 = vld [vmem:[%s2123_s3 + $0x28] sm:$0xff] }
   0xf   :  { %v264_v23 = vld [vmem:[%s2123_s3 + $0x20] sm:$0xff]  ;;  %v72_v24 = vld [vmem:[%s2121_s1 + $0x38] sm:$0xff]  ;;  %v71_v25 = vld [vmem:[%s2121_s1 + $0x30] sm:$0xff] }
  0x10   :  { %207 = vmatpush.msra.mxu1 %v190_v4  ;;  %1311 = vmatpush.msra.mxu2 %v190_v4  ;;  %v263_v26 = vld [vmem:[%s2123_s3 + $0x18] sm:$0xff]  ;;  %v70_v27 = vld [vmem:[%s2121_s1 + $0x28] sm:$0xff]  ;;  %v55_v28 = vld [vmem:[%s2120_s0 + $0x30] sm:$0xff] }
  0x11   :  { %130 = vmatpush.msra.mxu0 %v72_v24  ;;  %1299 = vmatpush.msra.mxu3 %v72_v24  ;;  %v262_v29 = vld [vmem:[%s2123_s3 + $0x10] sm:$0xff]  ;;  %v69_v30 = vld [vmem:[%s2121_s1 + $0x20] sm:$0xff]  ;;  %v261_v31 = vld [vmem:[%s2123_s3 + $0x8] sm:$0xff] }
  0x12   :  { %208 = vmatpush.msra.mxu1 %v189_v5  ;;  %1312 = vmatpush.msra.mxu2 %v189_v5  ;;  %v68_v32 = vld [vmem:[%s2121_s1 + $0x18] sm:$0xff]  ;;  %v260_v33 = vld [vmem:[%s2123_s3] sm:$0xff]  ;;  %v67_v34 = vld [vmem:[%s2121_s1 + $0x10] sm:$0xff]  ;;  %s1185_s3 = sshll.u32 %s2129_s9, 4  ;;  %s1475_s9 = smov [#allocation5]   ;;  %s1186_s3 = int_to_ptr.hbm [resolvable:$true] %s1185_s3 }
  0x13   :  { %131 = vmatpush.msra.mxu0 %v71_v25  ;;  %1300 = vmatpush.msra.mxu3 %v71_v25  ;;  %v66_v35 = vld [vmem:[%s2121_s1 + $0x8] sm:$0xff]  ;;  %v56_v36 = vld [vmem:[%s2120_s0 + $0x38] sm:$0xff]  ;;  %v65_v37 = vld [vmem:[%s2121_s1] sm:$0xff]  ;;  %s1170_s26 = sshll.u32 %s1475_s9, 4  ;;  %s1172_s1 = sshll.u32 %s2128_s8, 4  ;;  %s1171_s26 = int_to_ptr.vmem [resolvable:$true] %s1170_s26  ;;  %s1173_s1 = int_to_ptr.hbm [resolvable:$true] %s1172_s1 }
  0x14   :  { %209 = vmatpush.msra.mxu1 %v188_v6  ;;  %1313 = vmatpush.msra.mxu2 %v188_v6  ;;  %v57_v38 = vld [vmem:[%s2120_s0 + $0x40] sm:$0xff]  ;;  %v58_v39 = vld [vmem:[%s2120_s0 + $0x48] sm:$0xff]  ;;  %v1773_v51 = vld [vmem:[%s2126_s6 + $0x78] sm:$0xff] }
  0x15   :  { %132 = vmatpush.msra.mxu0 %v70_v27  ;;  %1301 = vmatpush.msra.mxu3 %v70_v27  ;;  %v1779_v54 = vld [vmem:[%s2126_s6 + $0x70] sm:$0xff]  ;;  %v1790_v57 = vld [vmem:[%s2126_s6 + $0x68] sm:$0xff]  ;;  %v1797_v59 = vld [vmem:[%s2126_s6 + $0x60] sm:$0xff] }
  0x16   :  { %210 = vmatpush.msra.mxu1 %v187_v7  ;;  %1314 = vmatpush.msra.mxu2 %v187_v7  ;;  %v1804_v62 = vld [vmem:[%s2126_s6 + $0x58] sm:$0xff]  ;;  %v964_v2 = vld [vmem:[#allocation2 + $0x30] sm:$0xff]  ;;  %v963_v6 = vld [vmem:[#allocation2 + $0x28] sm:$0xff] }
  0x17   :  { %1219 = vmatmul.msk.f32.vlgmr.msra.gmra.mxu1 %vm73_vm0, %v1559_v8  ;;  %1229 = vmatmul.msk.f32.vlgmr.msra.gmra.mxu2 %vm73_vm0, %v1564_v9  ;;  %v965_v1 = vld [vmem:[#allocation2 + $0x38] sm:$0xff]  ;;  %v1811_v3 = vld [vmem:[%s2126_s6 + $0x50] sm:$0xff]  ;;  %v962_v7 = vld [vmem:[#allocation2 + $0x20] sm:$0xff] }
  0x18   :  { %276 = vmatpush.msrb.mxu2 %v267_v18  ;;  %133 = vmatpush.msra.mxu0 %v69_v30  ;;  %v958_v18 = vld [vmem:[#allocation2] sm:$0xff]  ;;  %v334_v24 = vld [vmem:[%s2126_s6 + $0x8] sm:$0xff] }
  0x19   :  { %1302 = vmatpush.msra.mxu3 %v69_v30  ;;  %v335_v30 = vld [vmem:[%s2126_s6 + $0x10] sm:$0xff] }
  0x1a   :  { %277 = vmatpush.msrb.mxu2 %v266_v21  ;;  %134 = vmatpush.msra.mxu0 %v68_v32  ;;  %v340_v21 = vld [vmem:[%s2126_s6 + $0x38] sm:$0xff] }
  0x1b   :  { %1303 = vmatpush.msra.mxu3 %v68_v32 }
  0x1c   :  { %278 = vmatpush.msrb.mxu2 %v265_v22  ;;  %135 = vmatpush.msra.mxu0 %v67_v34 }
  0x1d   :  { %1304 = vmatpush.msra.mxu3 %v67_v34 }
  0x1e   :  { %279 = vmatpush.msrb.mxu2 %v264_v23  ;;  %136 = vmatpush.msra.mxu0 %v66_v35  ;;  %v339_v23 = vld [vmem:[%s2126_s6 + $0x30] sm:$0xff] }
  0x1f   :  { %1220 = vmatmul.msk.f32.gmra.mxu1 %vm73_vm0, %v1573_v10  ;;  %1230 = vmatmul.msk.f32.gmra.mxu2 %vm73_vm0, %v1578_v11 }
  0x20   :  { %280 = vmatpush.msrb.mxu2 %v263_v26  ;;  %1305 = vmatpush.msra.mxu3 %v66_v35  ;;  %v336_v35 = vld [vmem:[%s2126_s6 + $0x18] sm:$0xff] }
  0x21   :  { %137 = vmatpush.msra.mxu0 %v65_v37 }
  0x22   :  { %281 = vmatpush.msrb.mxu2 %v262_v29  ;;  %1203 = vmatmul.msk.f32.vlgmr.msra.gmra.mxu0 %vm73_vm0, %v1559_v8 }
  0x23   :  { %1306 = vmatpush.msra.mxu3 %v65_v37  ;;  %1022 = vmatpush.msrb.mxu0 %v965_v1 }
  0x24   :  { %282 = vmatpush.msrb.mxu2 %v261_v31  ;;  %1213 = vmatmul.msk.f32.vlgmr.msra.gmra.mxu3 %vm73_vm0, %v1564_v9  ;;  %v337_v31 = vld [vmem:[%s2126_s6 + $0x20] sm:$0xff] }
  0x25   :  { %1023 = vmatpush.msrb.mxu0 %v964_v2 }
  0x26   :  { %283 = vmatpush.msrb.mxu2 %v260_v33 }
  0x27   :  { %1221 = vmatmul.msk.f32.gmra.mxu1 %vm73_vm0, %v1587_v12  ;;  %1231 = vmatmul.msk.f32.gmra.mxu2 %vm73_vm0, %v1592_v13 }
  0x28   :  { %1315 = vmatpush.msra.mxu2 %v965_v1  ;;  %1024 = vmatpush.msrb.mxu0 %v963_v6 }
  0x2a   :  { %1204 = vmatmul.msk.f32.gmra.mxu0 %vm73_vm0, %v1573_v10  ;;  %1316 = vmatpush.msra.mxu2 %v964_v2 }
  0x2b   :  { %1025 = vmatpush.msrb.mxu0 %v962_v7 }
  0x2c   :  { %1214 = vmatmul.msk.f32.gmra.mxu3 %vm73_vm0, %v1578_v11  ;;  %1317 = vmatpush.msra.mxu2 %v963_v6 }
  0x2e   :  { %1318 = vmatpush.msra.mxu2 %v962_v7 }
  0x2f   :  { %1222 = vmatmul.msk.f32.gmra.mxu1 %vm73_vm0, %v1601_v14  ;;  %1232 = vmatmul.msk.f32.gmra.mxu2 %vm73_vm0, %v1606_v15 }
  0x32   :  { %1205 = vmatmul.msk.f32.gmra.mxu0 %vm73_vm0, %v1587_v12 }
  0x34   :  { %1215 = vmatmul.msk.f32.gmra.mxu3 %vm73_vm0, %v1592_v13 }
  0x37   :  { %1223 = vmatmul.msk.f32.gmra.mxu1 %vm73_vm0, %v1615_v16  ;;  %1233 = vmatmul.msk.f32.gmra.mxu2 %vm73_vm0, %v1620_v17 }
  0x3a   :  { %1206 = vmatmul.msk.f32.gmra.mxu0 %vm73_vm0, %v1601_v14 }
  0x3c   :  { %1216 = vmatmul.msk.f32.gmra.mxu3 %vm73_vm0, %v1606_v15 }
  0x3f   :  { %1224 = vmatmul.msk.f32.gmra.mxu1 %vm73_vm0, %v1632_v19  ;;  %1234 = vmatmul.msk.f32.gmra.mxu2 %vm73_vm0, %v1637_v20 }
  0x42   :  { %1207 = vmatmul.msk.f32.gmra.mxu0 %vm73_vm0, %v1615_v16 }
  0x44   :  { %1217 = vmatmul.msk.f32.gmra.mxu3 %vm73_vm0, %v1620_v17 }
  0x47   :  { %1225 = vmatmul.msk.f32.gmra.mxu1 %vm73_vm0, %v55_v28  ;;  %1235 = vmatmul.msk.f32.vlgmr.msrb.gmra.mxu2 %vm73_vm0, %v1559_v8 }
  0x4a   :  { %1208 = vmatmul.msk.f32.gmra.mxu0 %vm73_vm0, %v1632_v19 }
  0x4c   :  { %1218 = vmatmul.msk.f32.gmra.mxu3 %vm73_vm0, %v1637_v20 }
  0x4f   :  { %1226 = vmatmul.msk.f32.gmra.mxu1 %vm73_vm0, %v56_v36  ;;  %1236 = vmatmul.msk.f32.gmra.mxu2 %vm73_vm0, %v1573_v10  ;;  %v961_v10 = vld [vmem:[#allocation2 + $0x18] sm:$0xff] }
  0x50   :  { %1026 = vmatpush.msrb.mxu0 %v961_v10  ;;  %1319 = vmatpush.msra.mxu2 %v961_v10 }
  0x52   :  { %1209 = vmatmul.msk.f32.gmra.mxu0 %vm73_vm0, %v55_v28 }
  0x57   :  { %1227 = vmatmul.msk.f32.gmra.mxu1 %vm73_vm0, %v57_v38  ;;  %1237 = vmatmul.msk.f32.gmra.mxu2 %vm73_vm0, %v1587_v12 }
  0x5a   :  { %1210 = vmatmul.msk.f32.gmra.mxu0 %vm73_vm0, %v56_v36 }
  0x5f   :  { %1228 = vmatmul.msk.f32.gmra.mxu1 %vm73_vm0, %v58_v39  ;;  %1238 = vmatmul.msk.f32.gmra.mxu2 %vm73_vm0, %v1601_v14  ;;  %v1825_v14 = vld [vmem:[%s2126_s6 + $0x40] sm:$0xff] }
  0x62   :  { %1211 = vmatmul.msk.f32.gmra.mxu0 %vm73_vm0, %v57_v38 }
  0x67   :  { %1239 = vmatmul.msk.f32.gmra.mxu2 %vm73_vm0, %v1615_v16 }
  0x6a   :  { %1212 = vmatmul.msk.f32.gmra.mxu0 %vm73_vm0, %v58_v39 }
  0x6f   :  { %1240 = vmatmul.msk.f32.gmra.mxu2 %vm73_vm0, %v1632_v19 }
  0x77   :  { %1241 = vmatmul.msk.f32.gmra.mxu2 %vm73_vm0, %v55_v28  ;;  %v338_v28 = vld [vmem:[%s2126_s6 + $0x28] sm:$0xff] }
  0x7f   :  { %1242 = vmatmul.msk.f32.gmra.mxu2 %vm73_vm0, %v56_v36 }
  0x87   :  { %1243 = vmatmul.msk.f32.gmra.mxu2 %vm73_vm0, %v57_v38 }
  0x8f   :  { %1244 = vmatmul.msk.f32.gmra.mxu2 %vm73_vm0, %v58_v39 }
  0x94   :  { %v1746_v40 = vpop.f32.mrf.mxu1 }
  0x97   :  { %1245 = vmatmul.msk.f32.gmra.mxu2 %vm73_vm0, %v1564_v9  ;;  %v1819_v9 = vld [vmem:[%s2126_s6 + $0x48] sm:$0xff] }
  0x9a   :  { %v242_v41 = vpop.f32.mrf.mxu2 }
  0x9b   :  { %v359_v5 = vmul.f32 %v1811_v3, %v242_v41 }
  0x9c   :  { %v1750_v42 = vpop.f32.mrf.mxu1 }
  0x9f   :  { %1246 = vmatmul.msk.f32.gmra.mxu2 %vm73_vm0, %v1578_v11  ;;  %v960_v11 = vld [vmem:[#allocation2 + $0x10] sm:$0xff]  ;;  %v139_v36 = vpop.f32.mrf.mxu0 }
  0xa0   :  { %1027 = vmatpush.msrb.mxu0 %v960_v11  ;;  %1320 = vmatpush.msra.mxu2 %v960_v11 }
  0xa2   :  { %v245_v43 = vpop.f32.mrf.mxu2 }
  0xa3   :  { %v360_v0 = vmul.f32 %v1804_v62, %v245_v43  ;;  %v350_v43 = vmul.f32 %v334_v24, %v1750_v42 }
  0xa4   :  { %v1754_v44 = vpop.f32.mrf.mxu1 }
  0xa5   :  { %v351_v41 = vmul.f32 %v335_v30, %v1754_v44 }
  0xa7   :  { %1247 = vmatmul.msk.f32.gmra.mxu2 %vm73_vm0, %v1592_v13 }
  0xaa   :  { %v248_v45 = vpop.f32.mrf.mxu2 }
  0xab   :  { %v361_v61 = vmul.f32 %v1797_v59, %v248_v45  ;;  %v142_v45 = vpop.f32.mrf.mxu0 }
  0xac   :  { %v1758_v46 = vpop.f32.mrf.mxu1 }
  0xad   :  { %v352_v37 = vmul.f32 %v336_v35, %v1758_v46 }
  0xaf   :  { %1248 = vmatmul.msk.f32.gmra.mxu2 %vm73_vm0, %v1606_v15  ;;  %v333_v15 = vld [vmem:[%s2126_s6] sm:$0xff] }
  0xb2   :  { %v251_v47 = vpop.f32.mrf.mxu2 }
  0xb3   :  { %v362_v58 = vmul.f32 %v1790_v57, %v251_v47  ;;  %v145_v44 = vpop.f32.mrf.mxu0 }
  0xb4   :  { %v1762_v48 = vpop.f32.mrf.mxu1 }
  0xb5   :  { %v353_v34 = vmul.f32 %v337_v31, %v1762_v48 }
  0xb7   :  { %1249 = vmatmul.msk.f32.gmra.mxu2 %vm73_vm0, %v1620_v17  ;;  %v959_v17 = vld [vmem:[#allocation2 + $0x8] sm:$0xff] }
  0xb8   :  { %1028 = vmatpush.msrb.mxu0 %v959_v17  ;;  %1321 = vmatpush.msra.mxu2 %v959_v17 }
  0xba   :  { %v254_v49 = vpop.f32.mrf.mxu2  ;;  %1029 = vmatpush.msrb.mxu0 %v958_v18  ;;  %1322 = vmatpush.msra.mxu2 %v958_v18 }
  0xbb   :  { %v363_v56 = vmul.f32 %v1779_v54, %v254_v49  ;;  %v349_v49 = vmul.f32 %v333_v15, %v1746_v40 }
  0xbc   :  { %v1766_v50 = vpop.f32.mrf.mxu1 }
  0xbd   :  { %v354_v29 = vmul.f32 %v338_v28, %v1766_v50 }
  0xbf   :  { %1250 = vmatmul.msk.f32.gmra.mxu2 %vm73_vm0, %v1637_v20 }
  0xc2   :  { %v257_v52 = vpop.f32.mrf.mxu2 }
  0xc3   :  { %v364_v53 = vmul.f32 %v1773_v51, %v257_v52 }
  0xc4   :  { %v1781_v55 = vpop.f32.mrf.mxu1 }
  0xc5   :  { %1251 = vmatpush.xpose.msk.msrb.mxu3 %vm73_vm0, %v364_v53  ;;  %v355_v27 = vmul.f32 %v339_v23, %v1781_v55  ;;  %v148_v53 = vpop.f32.mrf.mxu0 }
  0xc9   :  { %1252 = vmatpush.xpose.msk.msrb.mxu3 %vm73_vm0, %v363_v56 }
  0xca   :  { %v285_v63 = vpop.f32.mrf.mxu2 }
  0xcb   :  { %v365_v16 = vmul.f32 %v333_v15, %v285_v63 }
  0xcc   :  { %v233_v60 = vpop.f32.mrf.mxu1 }
  0xcd   :  { %1253 = vmatpush.xpose.msk.msrb.mxu3 %vm73_vm0, %v362_v58  ;;  %1283 = vmatmul.msk.f32.vlgmr.msrb.gmra.mxu0 %vm73_vm0, %v365_v16  ;;  %v356_v22 = vmul.f32 %v340_v21, %v233_v60  ;;  %v151_v56 = vpop.f32.mrf.mxu0 }
  0xd1   :  { %1254 = vmatpush.xpose.msk.msrb.mxu3 %vm73_vm0, %v361_v61 }
  0xd2   :  { %v288_v8 = vpop.f32.mrf.mxu2 }
  0xd3   :  { %v366_v25 = vmul.f32 %v334_v24, %v288_v8 }
  0xd4   :  { %v236_v4 = vpop.f32.mrf.mxu1 }
  0xd5   :  { %1255 = vmatpush.xpose.msk.msrb.mxu3 %vm73_vm0, %v360_v0  ;;  %v357_v20 = vmul.f32 %v1825_v14, %v236_v4  ;;  %1284 = vmatmul.msk.f32.gmra.mxu0 %vm73_vm0, %v366_v25  ;;  %v154_v61 = vpop.f32.mrf.mxu0 }
  0xd9   :  { %1256 = vmatpush.xpose.msk.msrb.mxu3 %vm73_vm0, %v359_v5 }
  0xda   :  { %v291_v19 = vpop.f32.mrf.mxu2 }
  0xdb   :  { %v367_v32 = vmul.f32 %v335_v30, %v291_v19 }
  0xdc   :  { %v239_v12 = vpop.f32.mrf.mxu1 }
  0xdd   :  { %v358_v13 = vmul.f32 %v1819_v9, %v239_v12  ;;  %1285 = vmatmul.msk.f32.gmra.mxu0 %vm73_vm0, %v367_v32  ;;  %v157_v1 = vpop.f32.mrf.mxu0  ;;  %v169_v12 = vpop.f32.mrf.mxu3 }
  0xdf   :  { %1257 = vmatpush.xpose.msk.msrb.mxu3 %vm73_vm0, %v358_v13 }
  0xe2   :  { %v294_v26 = vpop.f32.mrf.mxu2 }
  0xe3   :  { %1258 = vmatpush.xpose.msk.msrb.mxu3 %vm73_vm0, %v357_v20  ;;  %v368_v38 = vmul.f32 %v336_v35, %v294_v26 }
  0xe5   :  { %1286 = vmatmul.msk.f32.gmra.mxu0 %vm73_vm0, %v368_v38  ;;  %v160_v7 = vpop.f32.mrf.mxu0  ;;  %v561_v38 = vld [vmem:[%s2127_s7 + $0x18] sm:$0xff] }
  0xe7   :  { %1259 = vmatpush.xpose.msk.msrb.mxu3 %vm73_vm0, %v356_v22 }
  0xea   :  { %v297_v33 = vpop.f32.mrf.mxu2 }
  0xeb   :  { %1260 = vmatpush.xpose.msk.msrb.mxu3 %vm73_vm0, %v355_v27  ;;  %v369_v47 = vmul.f32 %v337_v31, %v297_v33  ;;  %v560_v33 = vld [vmem:[%s2127_s7 + $0x10] sm:$0xff] }
  0xed   :  { %1287 = vmatmul.msk.f32.gmra.mxu0 %vm73_vm0, %v369_v47  ;;  %v163_v10 = vpop.f32.mrf.mxu0  ;;  %v562_v47 = vld [vmem:[%s2127_s7 + $0x20] sm:$0xff] }
  0xef   :  { %1261 = vmatpush.xpose.msk.msrb.mxu3 %vm73_vm0, %v354_v29 }
  0xf2   :  { %v300_v39 = vpop.f32.mrf.mxu2 }
  0xf3   :  { %1262 = vmatpush.xpose.msk.msrb.mxu3 %vm73_vm0, %v353_v34  ;;  %v370_v46 = vmul.f32 %v338_v28, %v300_v39  ;;  %v559_v28 = vld [vmem:[%s2127_s7 + $0x8] sm:$0xff] }
  0xf5   :  { %1288 = vmatmul.msk.f32.gmra.mxu0 %vm73_vm0, %v370_v46  ;;  %v166_v13 = vpop.f32.mrf.mxu0 }
  0xf7   :  { %1263 = vmatpush.xpose.msk.msrb.mxu3 %vm73_vm0, %v352_v37 }
  0xfa   :  { %v303_v48 = vpop.f32.mrf.mxu2 }
  0xfb   :  { %1264 = vmatpush.xpose.msk.msrb.mxu3 %vm73_vm0, %v351_v41  ;;  %v371_v42 = vmul.f32 %v339_v23, %v303_v48  ;;  %v558_v23 = vld [vmem:[%s2127_s7] sm:$0xff] }
  0xfd   :  { %1289 = vmatmul.msk.f32.gmra.mxu0 %vm73_vm0, %v371_v42 }
  0xff   :  { %1265 = vmatpush.xpose.msk.msrb.mxu3 %vm73_vm0, %v350_v43 }
 0x102   :  { %v306_v50 = vpop.f32.mrf.mxu2 }
 0x103   :  { %1266 = vmatpush.xpose.msk.msrb.mxu3 %vm73_vm0, %v349_v49  ;;  %v372_v40 = vmul.f32 %v340_v21, %v306_v50  ;;  %v563_v50 = vld [vmem:[%s2127_s7 + $0x28] sm:$0xff] }
 0x105   :  { %1290 = vmatmul.msk.f32.gmra.mxu0 %vm73_vm0, %v372_v40 }
 0x106   :  { %1267 = vmatmul.msk.f32.vlgmr.msrb.gmra.mxu3 %vm73_vm0, %v139_v36 }
 0x10a   :  { %v309_v52 = vpop.f32.mrf.mxu2 }
 0x10b   :  { %v373_v58 = vmul.f32 %v1825_v14, %v309_v52  ;;  %v172_v14 = vpop.f32.mrf.mxu3 }
 0x10d   :  { %1291 = vmatmul.msk.f32.gmra.mxu0 %vm73_vm0, %v373_v58 }
 0x10e   :  { %1268 = vmatmul.msk.f32.gmra.mxu3 %vm73_vm0, %v142_v45 }
 0x112   :  { %v312_v55 = vpop.f32.mrf.mxu2 }
 0x113   :  { %v374_v63 = vmul.f32 %v1819_v9, %v312_v55  ;;  %v175_v15 = vpop.f32.mrf.mxu3  ;;  %v564_v55 = vld [vmem:[%s2127_s7 + $0x30] sm:$0xff] }
 0x115   :  { %1292 = vmatmul.msk.f32.gmra.mxu0 %vm73_vm0, %v374_v63  ;;  %v565_v63 = vld [vmem:[%s2127_s7 + $0x38] sm:$0xff] }
 0x116   :  { %1269 = vmatmul.msk.f32.gmra.mxu3 %vm73_vm0, %v145_v44 }
 0x11a   :  { %v315_v60 = vpop.f32.mrf.mxu2 }
 0x11b   :  { %v375_v2 = vmul.f32 %v1811_v3, %v315_v60 }
 0x11d   :  { %1293 = vmatmul.msk.f32.gmra.mxu0 %vm73_vm0, %v375_v2 }
 0x11e   :  { %1270 = vmatmul.msk.f32.gmra.mxu3 %vm73_vm0, %v148_v53 }
 0x122   :  { %v318_v0 = vpop.f32.mrf.mxu2 }
 0x123   :  { %v376_v5 = vmul.f32 %v1804_v62, %v318_v0 }
 0x125   :  { %1294 = vmatmul.msk.f32.gmra.mxu0 %vm73_vm0, %v376_v5 }
 0x126   :  { %1271 = vmatmul.msk.f32.gmra.mxu3 %vm73_vm0, %v151_v56 }
 0x12a   :  { %v321_v4 = vpop.f32.mrf.mxu2 }
 0x12b   :  { %v377_v8 = vmul.f32 %v1797_v59, %v321_v4 }
 0x12d   :  { %1295 = vmatmul.msk.f32.gmra.mxu0 %vm73_vm0, %v377_v8 }
 0x12e   :  { %1272 = vmatmul.msk.f32.gmra.mxu3 %vm73_vm0, %v154_v61 }
 0x132   :  { %v324_v6 = vpop.f32.mrf.mxu2 }
 0x133   :  { %v378_v3 = vmul.f32 %v1790_v57, %v324_v6 }
 0x135   :  { %1296 = vmatmul.msk.f32.gmra.mxu0 %vm73_vm0, %v378_v3 }
 0x136   :  { %1273 = vmatmul.msk.f32.gmra.mxu3 %vm73_vm0, %v157_v1 }
 0x13a   :  { %v327_v9 = vpop.f32.mrf.mxu2 }
 0x13b   :  { %v379_v59 = vmul.f32 %v1779_v54, %v327_v9 }
 0x13d   :  { %1297 = vmatmul.msk.f32.gmra.mxu0 %vm73_vm0, %v379_v59  ;;  %v566_v59 = vld [vmem:[%s2127_s7 + $0x40] sm:$0xff] }
 0x13e   :  { %1274 = vmatmul.msk.f32.gmra.mxu3 %vm73_vm0, %v160_v7 }
 0x142   :  { %v330_v11 = vpop.f32.mrf.mxu2 }
 0x143   :  { %v380_v62 = vmul.f32 %v1773_v51, %v330_v11  ;;  %v178_v51 = vpop.f32.mrf.mxu3 }
 0x145   :  { %1298 = vmatmul.msk.f32.vlgmr.msra.gmra.mxu2 %vm73_vm0, %v380_v62 }
 0x146   :  { %1275 = vmatmul.msk.f32.gmra.mxu3 %vm73_vm0, %v163_v10 }
 0x14a   :  { %v1905_v57 = vpop.f32.mrf.mxu0 }
 0x14b   :  { %v181_v54 = vpop.f32.mrf.mxu3 }
 0x14e   :  { %1276 = vmatmul.msk.f32.gmra.mxu3 %vm73_vm0, %v166_v13 }
 0x152   :  { %v1908_v16 = vpop.f32.mrf.mxu0 }
 0x153   :  { %v184_v19 = vpop.f32.mrf.mxu3 }
 0x156   :  { %1277 = vmatmul.msk.f32.gmra.mxu3 %vm73_vm0, %v169_v12 }
 0x15a   :  { %v1911_v17 = vpop.f32.mrf.mxu0 }
 0x15e   :  { %1278 = vmatmul.msk.f32.gmra.mxu3 %vm73_vm0, %v172_v14 }
 0x162   :  { %v1914_v18 = vpop.f32.mrf.mxu0 }
 0x166   :  { %1279 = vmatmul.msk.f32.gmra.mxu3 %vm73_vm0, %v175_v15 }
 0x16a   :  { %v1043_v20 = vpop.f32.mrf.mxu0 }
 0x16e   :  { %1280 = vmatmul.msk.f32.gmra.mxu3 %vm73_vm0, %v178_v51 }
 0x172   :  { %v1046_v21 = vpop.f32.mrf.mxu0 }
 0x176   :  { %1281 = vmatmul.msk.f32.gmra.mxu3 %vm73_vm0, %v181_v54 }
 0x17a   :  { %v1049_v26 = vpop.f32.mrf.mxu0 }
 0x17e   :  { %1282 = vmatmul.msk.f32.gmra.mxu3 %vm73_vm0, %v184_v19 }
 0x182   :  { %v1052_v31 = vpop.f32.mrf.mxu0 }
 0x189   :  { %v494_v22 = vpop.f32.mrf.mxu3 }
 0x18a   :  { %v542_v24 = vmul.f32 0.35355338, %v494_v22  ;;  %v1055_v36 = vpop.f32.mrf.mxu0 }
 0x18c   :  { %v1920_v25 = vadd.f32 %v558_v23, %v542_v24 }
 0x18e   :  { %590 = vmax.xlane.f32.xlu0 %v1920_v25 }
 0x191   :  { %v497_v27 = vpop.f32.mrf.mxu3 }
 0x192   :  { %v543_v29 = vmul.f32 0.35355338, %v497_v27  ;;  %v1058_v43 = vpop.f32.mrf.mxu0 }
 0x194   :  { %v1926_v30 = vadd.f32 %v559_v28, %v543_v29 }
 0x196   :  { %592 = vmax.xlane.f32.xlu0 %v1926_v30 }
 0x199   :  { %v500_v32 = vpop.f32.mrf.mxu3 }
 0x19a   :  { %v544_v34 = vmul.f32 0.35355338, %v500_v32  ;;  %v1061_v44 = vpop.f32.mrf.mxu0 }
 0x19c   :  { %v1932_v35 = vadd.f32 %v560_v33, %v544_v34  ;;  %v569_v34 = vld [vmem:[%s2127_s7 + $0x58] sm:$0xff] }
 0x19e   :  { %594 = vmax.xlane.f32.xlu1 %v1932_v35 }
 0x1a1   :  { %v503_v37 = vpop.f32.mrf.mxu3 }
 0x1a2   :  { %v545_v39 = vmul.f32 0.35355338, %v503_v37  ;;  %v1064_v53 = vpop.f32.mrf.mxu0 }
 0x1a4   :  { %v1938_v41 = vadd.f32 %v561_v38, %v545_v39 }
 0x1a6   :  { %596 = vmax.xlane.f32.xlu1 %v1938_v41 }
 0x1a9   :  { %v506_v45 = vpop.f32.mrf.mxu3 }
 0x1aa   :  { %v546_v48 = vmul.f32 0.35355338, %v506_v45  ;;  %v1067_v60 = vpop.f32.mrf.mxu0  ;;  %v570_v45 = vld [vmem:[%s2127_s7 + $0x60] sm:$0xff] }
 0x1ac   :  { %v1944_v49 = vadd.f32 %v562_v47, %v546_v48 }
 0x1ae   :  { %598 = vmax.xlane.f32.xlu2 %v1944_v49 }
 0x1b1   :  { %v509_v46 = vpop.f32.mrf.mxu3 }
 0x1b2   :  { %v547_v42 = vmul.f32 0.35355338, %v509_v46  ;;  %v1070_v2 = vpop.f32.mrf.mxu0 }
 0x1b4   :  { %v1950_v52 = vadd.f32 %v563_v50, %v547_v42  ;;  %v571_v42 = vld [vmem:[%s2127_s7 + $0x68] sm:$0xff] }
 0x1b6   :  { %600 = vmax.xlane.f32.xlu2 %v1950_v52 }
 0x1b9   :  { %v512_v40 = vpop.f32.mrf.mxu3 }
 0x1ba   :  { %v548_v56 = vmul.f32 0.35355338, %v512_v40  ;;  %v1073_v5 = vpop.f32.mrf.mxu0 }
 0x1bc   :  { %v1956_v58 = vadd.f32 %v564_v55, %v548_v56 }
 0x1be   :  { %602 = vmax.xlane.f32.xlu0 %v1956_v58 }
 0x1c1   :  { %v515_v61 = vpop.f32.mrf.mxu3 }
 0x1c2   :  { %v549_v0 = vmul.f32 0.35355338, %v515_v61  ;;  %v572_v61 = vld [vmem:[%s2127_s7 + $0x70] sm:$0xff] }
 0x1c4   :  { %v1962_v1 = vadd.f32 %v565_v63, %v549_v0 }
 0x1c6   :  { %604 = vmax.xlane.f32.xlu2 %v1962_v1 }
 0x1c8   :  { %v1076_v4 = vpop.f32.mrf.mxu2 }
 0x1c9   :  { %1079 = vmatpush.msrb.mxu1 %v1076_v4  ;;  %v518_v6 = vpop.f32.mrf.mxu3  ;;  %v573_v4 = vld [vmem:[%s2127_s7 + $0x78] sm:$0xff] }
 0x1ca   :  { %v550_v13 = vmul.f32 0.35355338, %v518_v6 }
 0x1cb   :  { %1080 = vmatpush.msrb.mxu1 %v1073_v5 }
 0x1cc   :  { %v1977_v15 = vadd.f32 %v566_v59, %v550_v13 }
 0x1cd   :  { %1081 = vmatpush.msrb.mxu1 %v1070_v2 }
 0x1cf   :  { %1082 = vmatpush.msrb.mxu1 %v1067_v60 }
 0x1d1   :  { %1083 = vmatpush.msrb.mxu1 %v1064_v53  ;;  %v521_v10 = vpop.f32.mrf.mxu3 }
 0x1d2   :  { %v551_v54 = vmul.f32 0.35355338, %v521_v10 }
 0x1d3   :  { %1084 = vmatpush.msrb.mxu1 %v1061_v44 }
 0x1d5   :  { %1085 = vmatpush.msrb.mxu1 %v1058_v43 }
 0x1d7   :  { %1086 = vmatpush.msrb.mxu1 %v1055_v36 }
 0x1d9   :  { %1087 = vmatpush.msrb.mxu1 %v1052_v31 }
 0x1db   :  { %1088 = vmatpush.msrb.mxu1 %v1049_v26  ;;  %v568_v26 = vld [vmem:[%s2127_s7 + $0x50] sm:$0xff] }
 0x1dd   :  { %1089 = vmatpush.msrb.mxu1 %v1046_v21 }
 0x1df   :  { %1090 = vmatpush.msrb.mxu1 %v1043_v20 }
 0x1e1   :  { %1091 = vmatpush.msrb.mxu1 %v1914_v18  ;;  %v567_v18 = vld [vmem:[%s2127_s7 + $0x48] sm:$0xff] }
 0x1e2   :  { %v1987_v20 = vadd.f32 %v567_v18, %v551_v54 }
 0x1e3   :  { %1092 = vmatpush.msrb.mxu1 %v1911_v17 }
 0x1e5   :  { %1093 = vmatpush.msrb.mxu1 %v1908_v16 }
 0x1e7   :  { %1094 = vmatpush.msrb.mxu1 %v1905_v57  ;;  %v524_v57 = vpop.f32.mrf.mxu3 }
 0x1ef   :  { %v527_v23 = vpop.f32.mrf.mxu3 }
 0x1f0   :  { %v553_v33 = vmul.f32 0.35355338, %v527_v23 }
 0x1f2   :  { %v2008_v37 = vadd.f32 %v569_v34, %v553_v33 }
 0x1f7   :  { %v530_v32 = vpop.f32.mrf.mxu3 }
 0x1ff   :  { %v533_v43 = vpop.f32.mrf.mxu3 }
 0x200   :  { %v555_v50 = vmul.f32 0.35355338, %v533_v43 }
 0x201   :  { %v591_v7 = vpop.xlane.xlu0 %590 }
 0x202   :  { %v622_v8 = vsub.f32 %v1920_v25, %v591_v7  ;;  %v552_v25 = vmul.f32 0.35355338, %v524_v57  ;;  %v2028_v55 = vadd.f32 %v571_v42, %v555_v50 }
 0x204   :  { %v638_v9 = vmul.f32 1.442695, %v622_v8  ;;  %v1998_v29 = vadd.f32 %v568_v26, %v552_v25 }
 0x206   :  { %1329 = vpow2.f32 %v638_v9 }
 0x207   :  { %v536_v53 = vpop.f32.mrf.mxu3 }
 0x208   :  { %v556_v60 = vmul.f32 0.35355338, %v536_v53 }
 0x209   :  { %v593_v3 = vpop.xlane.xlu0 %592 }
 0x20a   :  { %v623_v11 = vsub.f32 %v1926_v30, %v593_v3  ;;  %v2037_v63 = vadd.f32 %v572_v61, %v556_v60 }
 0x20c   :  { %v1971_v12 = vpop.eup %1329  ;;  %v640_v62 = vmul.f32 1.442695, %v623_v11 }
 0x20d   :  { %670 = vadd.xlane.f32.xlu1 %v1971_v12 }
 0x20e   :  { %1331 = vpow2.f32 %v640_v62 }
 0x211   :  { %v595_v14 = vpop.xlane.xlu1 %594 }
 0x212   :  { %v624_v51 = vsub.f32 %v1932_v35, %v595_v14 }
 0x214   :  { %v1980_v16 = vpop.eup %1331  ;;  %v642_v17 = vmul.f32 1.442695, %v624_v51 }
 0x215   :  { %672 = vadd.xlane.f32.xlu0 %v1980_v16  ;;  %606 = vmax.xlane.f32.xlu1 %v1977_v15 }
 0x216   :  { %1333 = vpow2.f32 %v642_v17 }
 0x219   :  { %v597_v19 = vpop.xlane.xlu1 %596 }
 0x21a   :  { %v625_v21 = vsub.f32 %v1938_v41, %v597_v19  ;;  %v554_v41 = vmul.f32 0.35355338, %v530_v32 }
 0x21c   :  { %v1990_v22 = vpop.eup %1333  ;;  %v644_v24 = vmul.f32 1.442695, %v625_v21 }
 0x21d   :  { %674 = vadd.xlane.f32.xlu2 %v1990_v22  ;;  %608 = vmax.xlane.f32.xlu0 %v1987_v20 }
 0x21e   :  { %1335 = vpow2.f32 %v644_v24 }
 0x221   :  { %v599_v27 = vpop.xlane.xlu2 %598 }
 0x222   :  { %v626_v28 = vsub.f32 %v1944_v49, %v599_v27  ;;  %v2018_v49 = vadd.f32 %v570_v45, %v554_v41 }
 0x224   :  { %v2000_v30 = vpop.eup %1335  ;;  %v646_v31 = vmul.f32 1.442695, %v626_v28 }
 0x225   :  { %676 = vadd.xlane.f32.xlu1 %v2000_v30  ;;  %610 = vmax.xlane.f32.xlu2 %v1998_v29 }
 0x226   :  { %1337 = vpow2.f32 %v646_v31 }
 0x229   :  { %v601_v35 = vpop.xlane.xlu2 %600 }
 0x22a   :  { %v627_v36 = vsub.f32 %v1950_v52, %v601_v35 }
 0x22c   :  { %v2010_v38 = vpop.eup %1337  ;;  %v648_v39 = vmul.f32 1.442695, %v627_v36 }
 0x22d   :  { %678 = vadd.xlane.f32.xlu0 %v2010_v38  ;;  %612 = vmax.xlane.f32.xlu1 %v2008_v37 }
 0x22e   :  { %1339 = vpow2.f32 %v648_v39 }
 0x231   :  { %v603_v47 = vpop.xlane.xlu0 %602 }
 0x232   :  { %v628_v48 = vsub.f32 %v1956_v58, %v603_v47 }
 0x234   :  { %v2020_v44 = vpop.eup %1339  ;;  %v650_v46 = vmul.f32 1.442695, %v628_v48 }
 0x235   :  { %680 = vadd.xlane.f32.xlu2 %v2020_v44  ;;  %614 = vmax.xlane.f32.xlu0 %v2018_v49 }
 0x236   :  { %1341 = vpow2.f32 %v650_v46 }
 0x239   :  { %v605_v52 = vpop.xlane.xlu2 %604 }
 0x23a   :  { %v629_v40 = vsub.f32 %v1962_v1, %v605_v52  ;;  %v539_v1 = vpop.f32.mrf.mxu3 }
 0x23b   :  { %v557_v2 = vmul.f32 0.35355338, %v539_v1 }
 0x23c   :  { %v2030_v56 = vpop.eup %1341  ;;  %v652_v58 = vmul.f32 1.442695, %v629_v40 }
 0x23d   :  { %682 = vadd.xlane.f32.xlu1 %v2030_v56  ;;  %616 = vmax.xlane.f32.xlu2 %v2028_v55  ;;  %v2046_v5 = vadd.f32 %v573_v4, %v557_v2 }
 0x23e   :  { %1343 = vpow2.f32 %v652_v58 }
 0x244   :  { %v2039_v0 = vpop.eup %1343 }
 0x245   :  { %684 = vadd.xlane.f32.xlu0 %v2039_v0  ;;  %618 = vmax.xlane.f32.xlu1 %v2037_v63 }
 0x24d   :  { %620 = vmax.xlane.f32.xlu0 %v2046_v5 }
 0x280   :  { %v671_v6 = vpop.xlane.xlu1 %670 }
 0x281   :  { %1345 = vrcp.f32 %v671_v6  ;;  %v713_v62 = vand.u32 2147483648, %v671_v6  ;;  %v711_v14 = vand.u32 2147483647, %v671_v6  ;;  %vm707_vm2 = vweird.f32 %v671_v6 }
 0x283   :  { %v714_v17 = vor.u32 1.1754944e-38, %v713_v62  ;;  %vm712_vm4 = vcmp.eq.f32.partialorder %v711_v14, 8.507059e+37 }
 0x287   :  { %v1346_v7 = vpop.eup %1345 }
 0x288   :  { %v703_v8 = vmul.f32 %v1346_v7, %v671_v6  ;;  %v673_v9 = vpop.xlane.xlu0 %672  ;;  %v607_v10 = vpop.xlane.xlu1 %606  ;;  %vm708_vm1 = vweird.f32 %v1346_v7 }
 0x289   :  { %1347 = vrcp.f32 %v673_v9  ;;  %v630_v3 = vsub.f32 %v1977_v15, %v607_v10  ;;  %vm709_vm3 = vmor %vm707_vm2, %vm708_vm1  ;;  %v727_v28 = vand.u32 2147483648, %v673_v9  ;;  %v725_v32 = vand.u32 2147483647, %v673_v9 }
 0x28a   :  { %v704_v11 = vsub.f32 1.0, %v703_v8  ;;  %vm721_vm6 = vweird.f32 %v673_v9 }
 0x28b   :  { %v654_v13 = vmul.f32 1.442695, %v630_v3  ;;  %vm726_vm8 = vcmp.eq.f32.partialorder %v725_v32, 8.507059e+37 }
 0x28c   :  { %v705_v59 = vmul.f32 %v1346_v7, %v704_v11 }
 0x28d   :  { %1349 = vpow2.f32 %v654_v13 }
 0x28e   :  { %v706_v57 = vadd.f32 %v1346_v7, %v705_v59 }
 0x28f   :  { %v1348_v51 = vpop.eup %1347 }
 0x290   :  { %v717_v54 = vmul.f32 %v1348_v51, %v673_v9  ;;  %v675_v18 = vpop.xlane.xlu2 %674  ;;  %v609_v19 = vpop.xlane.xlu0 %608  ;;  %v710_v21 = vsel %vm709_vm3, %v1346_v7, %v706_v57  ;;  %vm722_vm5 = vweird.f32 %v1348_v51 }
 0x291   :  { %1351 = vrcp.f32 %v675_v18  ;;  %v631_v15 = vsub.f32 %v1987_v20, %v609_v19  ;;  %v715_v23 = vsel %vm712_vm4, %v714_v17, %v710_v21  ;;  %vm723_vm7 = vmor %vm721_vm6, %vm722_vm5  ;;  %v728_v20 = vor.u32 1.1754944e-38, %v727_v28 }
 0x292   :  { %v718_v24 = vsub.f32 1.0, %v717_v54  ;;  %v926_v25 = vmul.f32 %v1971_v12, %v715_v23  ;;  %v741_v50 = vand.u32 2147483648, %v675_v18  ;;  %v739_v52 = vand.u32 2147483647, %v675_v18 }
 0x293   :  { %v2052_v26 = vpop.eup %1349  ;;  %v656_v27 = vmul.f32 1.442695, %v631_v15  ;;  %vm735_vm10 = vweird.f32 %v675_v18 }
 0x294   :  { %v719_v31 = vmul.f32 %v1348_v51, %v718_v24  ;;  %942 = vst [vmem:[#allocation6] sm:$0xff] %v926_v25  ;;  %1095 = vmatmul.f32.vlgmr.msrb.gmra.mxu1 %v926_v25  ;;  %686 = vadd.xlane.f32.xlu2 %v2052_v26  ;;  %vm740_vm12 = vcmp.eq.f32.partialorder %v739_v52, 8.507059e+37 }
 0x295   :  { %1353 = vpow2.f32 %v656_v27 }
 0x296   :  { %v720_v33 = vadd.f32 %v1348_v51, %v719_v31 }
 0x297   :  { %v1352_v34 = vpop.eup %1351 }
 0x298   :  { %v731_v35 = vmul.f32 %v1352_v34, %v675_v18  ;;  %v677_v36 = vpop.xlane.xlu1 %676  ;;  %v611_v12 = vpop.xlane.xlu2 %610  ;;  %v724_v39 = vsel %vm723_vm7, %v1348_v51, %v720_v33  ;;  %vm736_vm9 = vweird.f32 %v1352_v34 }
 0x299   :  { %1355 = vrcp.f32 %v677_v36  ;;  %v632_v41 = vsub.f32 %v1998_v29, %v611_v12  ;;  %v729_v43 = vsel %vm726_vm8, %v728_v20, %v724_v39  ;;  %vm737_vm11 = vmor %vm735_vm10, %vm736_vm9  ;;  %v742_v29 = vor.u32 1.1754944e-38, %v741_v50 }
 0x29a   :  { %v732_v45 = vsub.f32 1.0, %v731_v35  ;;  %v927_v47 = vmul.f32 %v1980_v16, %v729_v43  ;;  %v755_v9 = vand.u32 2147483648, %v677_v36  ;;  %v753_v3 = vand.u32 2147483647, %v677_v36 }
 0x29b   :  { %v2057_v48 = vpop.eup %1353  ;;  %v658_v46 = vmul.f32 1.442695, %v632_v41  ;;  %vm749_vm14 = vweird.f32 %v677_v36 }
 0x29c   :  { %v733_v42 = vmul.f32 %v1352_v34, %v732_v45  ;;  %943 = vst [vmem:[#allocation6 + $0x8] sm:$0xff] %v927_v47  ;;  %1098 = vmatmul.f32.gmra.mxu1 %v927_v47  ;;  %688 = vadd.xlane.f32.xlu1 %v2057_v48  ;;  %vm754_vm1 = vcmp.eq.f32.partialorder %v753_v3, 8.507059e+37 }
 0x29d   :  { %1357 = vpow2.f32 %v658_v46 }
 0x29e   :  { %v734_v53 = vadd.f32 %v1352_v34, %v733_v42 }
 0x29f   :  { %v1356_v40 = vpop.eup %1355 }
 0x2a0   :  { %v745_v58 = vmul.f32 %v1356_v40, %v677_v36  ;;  %v679_v60 = vpop.xlane.xlu0 %678  ;;  %v613_v16 = vpop.xlane.xlu1 %612  ;;  %v738_v61 = vsel %vm737_vm11, %v1352_v34, %v734_v53  ;;  %vm750_vm13 = vweird.f32 %v1356_v40 }
 0x2a1   :  { %1359 = vrcp.f32 %v679_v60  ;;  %v633_v1 = vsub.f32 %v2008_v37, %v613_v16  ;;  %v743_v2 = vsel %vm740_vm12, %v742_v29, %v738_v61  ;;  %vm751_vm15 = vmor %vm749_vm14, %vm750_vm13  ;;  %v756_v37 = vor.u32 1.1754944e-38, %v755_v9 }
 0x2a2   :  { %v746_v4 = vsub.f32 1.0, %v745_v58  ;;  %v928_v6 = vmul.f32 %v1990_v22, %v743_v2  ;;  %v769_v21 = vand.u32 2147483648, %v679_v60  ;;  %v767_v23 = vand.u32 2147483647, %v679_v60 }
 0x2a3   :  { %v2062_v7 = vpop.eup %1357  ;;  %v660_v8 = vmul.f32 1.442695, %v633_v1  ;;  %vm763_vm3 = vweird.f32 %v679_v60 }
 0x2a4   :  { %v747_v10 = vmul.f32 %v1356_v40, %v746_v4  ;;  %944 = vst [vmem:[#allocation6 + $0x10] sm:$0xff] %v928_v6  ;;  %1101 = vmatmul.f32.gmra.mxu1 %v928_v6  ;;  %690 = vadd.xlane.f32.xlu2 %v2062_v7  ;;  %vm768_vm5 = vcmp.eq.f32.partialorder %v767_v23, 8.507059e+37 }
 0x2a5   :  { %1361 = vpow2.f32 %v660_v8 }
 0x2a6   :  { %v748_v11 = vadd.f32 %v1356_v40, %v747_v10 }
 0x2a7   :  { %v1360_v62 = vpop.eup %1359 }
 0x2a8   :  { %v759_v13 = vmul.f32 %v1360_v62, %v679_v60  ;;  %v681_v59 = vpop.xlane.xlu2 %680  ;;  %v615_v22 = vpop.xlane.xlu0 %614  ;;  %v752_v14 = vsel %vm751_vm15, %v1356_v40, %v748_v11  ;;  %vm764_vm2 = vweird.f32 %v1360_v62 }
 0x2a9   :  { %1363 = vrcp.f32 %v681_v59  ;;  %v634_v57 = vsub.f32 %v2018_v49, %v615_v22  ;;  %v757_v51 = vsel %vm754_vm1, %v756_v37, %v752_v14  ;;  %vm765_vm4 = vmor %vm763_vm3, %vm764_vm2  ;;  %v770_v49 = vor.u32 1.1754944e-38, %v769_v21 }
 0x2aa   :  { %v760_v17 = vsub.f32 1.0, %v759_v13  ;;  %v929_v54 = vmul.f32 %v2000_v30, %v757_v51  ;;  %v783_v12 = vand.u32 2147483648, %v681_v59  ;;  %v781_v41 = vand.u32 2147483647, %v681_v59 }
 0x2ab   :  { %v2067_v18 = vpop.eup %1361  ;;  %v662_v19 = vmul.f32 1.442695, %v634_v57  ;;  %vm777_vm7 = vweird.f32 %v681_v59 }
 0x2ac   :  { %v761_v15 = vmul.f32 %v1360_v62, %v760_v17  ;;  %945 = vst [vmem:[#allocation6 + $0x18] sm:$0xff] %v929_v54  ;;  %1104 = vmatmul.f32.gmra.mxu1 %v929_v54  ;;  %692 = vadd.xlane.f32.xlu0 %v2067_v18  ;;  %vm782_vm9 = vcmp.eq.f32.partialorder %v781_v41, 8.507059e+37 }
 0x2ad   :  { %1365 = vpow2.f32 %v662_v19 }
 0x2ae   :  { %v762_v24 = vadd.f32 %v1360_v62, %v761_v15 }
 0x2af   :  { %v1364_v25 = vpop.eup %1363 }
 0x2b0   :  { %v773_v27 = vmul.f32 %v1364_v25, %v681_v59  ;;  %v683_v28 = vpop.xlane.xlu1 %682  ;;  %v617_v30 = vpop.xlane.xlu2 %616  ;;  %v766_v31 = vsel %vm765_vm4, %v1360_v62, %v762_v24  ;;  %vm778_vm6 = vweird.f32 %v1364_v25 }
 0x2b1   :  { %1367 = vrcp.f32 %v683_v28  ;;  %v635_v32 = vsub.f32 %v2028_v55, %v617_v30  ;;  %v771_v33 = vsel %vm768_vm5, %v770_v49, %v766_v31  ;;  %vm779_vm8 = vmor %vm777_vm7, %vm778_vm6  ;;  %v784_v55 = vor.u32 1.1754944e-38, %v783_v12 }
 0x2b2   :  { %v774_v34 = vsub.f32 1.0, %v773_v27  ;;  %v930_v20 = vmul.f32 %v2010_v38, %v771_v33  ;;  %v797_v60 = vand.u32 2147483648, %v683_v28  ;;  %v795_v61 = vand.u32 2147483647, %v683_v28 }
 0x2b3   :  { %v2072_v35 = vpop.eup %1365  ;;  %v664_v36 = vmul.f32 1.442695, %v635_v32  ;;  %vm791_vm11 = vweird.f32 %v683_v28 }
 0x2b4   :  { %v775_v39 = vmul.f32 %v1364_v25, %v774_v34  ;;  %946 = vst [vmem:[#allocation6 + $0x20] sm:$0xff] %v930_v20  ;;  %1107 = vmatmul.f32.gmra.mxu1 %v930_v20  ;;  %694 = vadd.xlane.f32.xlu1 %v2072_v35  ;;  %vm796_vm13 = vcmp.eq.f32.partialorder %v795_v61, 8.507059e+37 }
 0x2b5   :  { %1369 = vpow2.f32 %v664_v36 }
 0x2b6   :  { %v776_v43 = vadd.f32 %v1364_v25, %v775_v39 }
 0x2b7   :  { %v1368_v45 = vpop.eup %1367 }
 0x2b8   :  { %v787_v47 = vmul.f32 %v1368_v45, %v683_v28  ;;  %v685_v46 = vpop.xlane.xlu0 %684  ;;  %v619_v38 = vpop.xlane.xlu1 %618  ;;  %v780_v50 = vsel %vm779_vm8, %v1364_v25, %v776_v43  ;;  %vm792_vm10 = vweird.f32 %v1368_v45  ;;  %v1328_v43 = vld [vmem:[%s2125_s5] ss:$0 sm:$0xff]  ;;  %s1474_s5 = smov [#allocation6]  }
 0x2b9   :  { %1371 = vrcp.f32 %v685_v46  ;;  %v636_v42 = vsub.f32 %v2037_v63, %v619_v38  ;;  %v785_v52 = vsel %vm782_vm9, %v784_v55, %v780_v50  ;;  %vm793_vm12 = vmor %vm791_vm11, %vm792_vm10  ;;  %v798_v63 = vor.u32 1.1754944e-38, %v797_v60  ;;  %s1183_s23 = sshll.u32 %s1474_s5, 4  ;;  %s1184_s23 = int_to_ptr.vmem [resolvable:$true] %s1183_s23 }
 0x2ba   :  { %v788_v53 = vsub.f32 1.0, %v787_v47  ;;  %v931_v40 = vmul.f32 %v2020_v44, %v785_v52  ;;  %v811_v37 = vand.u32 2147483648, %v685_v46  ;;  %v809_v59 = vand.u32 2147483647, %v685_v46 }
 0x2bb   :  { %v2077_v29 = vpop.eup %1369  ;;  %v666_v58 = vmul.f32 1.442695, %v636_v42  ;;  %vm805_vm15 = vweird.f32 %v685_v46 }
 0x2bc   :  { %v789_v16 = vmul.f32 %v1368_v45, %v788_v53  ;;  %947 = vst [vmem:[#allocation6 + $0x28] sm:$0xff] %v931_v40  ;;  %1110 = vmatmul.f32.gmra.mxu1 %v931_v40  ;;  %696 = vadd.xlane.f32.xlu2 %v2077_v29  ;;  %vm810_vm2 = vcmp.eq.f32.partialorder %v809_v59, 8.507059e+37 }
 0x2bd   :  { %1373 = vpow2.f32 %v666_v58 }
 0x2be   :  { %v790_v1 = vadd.f32 %v1368_v45, %v789_v16 }
 0x2bf   :  { %v1372_v2 = vpop.eup %1371 }
 0x2c0   :  { %v801_v4 = vmul.f32 %v1372_v2, %v685_v46  ;;  %v621_v6 = vpop.xlane.xlu0 %620  ;;  %v794_v44 = vsel %vm793_vm12, %v1368_v45, %v790_v1  ;;  %vm806_vm14 = vweird.f32 %v1372_v2 }
 0x2c1   :  { %v637_v8 = vsub.f32 %v2046_v5, %v621_v6  ;;  %v799_v9 = vsel %vm796_vm13, %v798_v63, %v794_v44  ;;  %vm807_vm1 = vmor %vm805_vm15, %vm806_vm14  ;;  %v812_v5 = vor.u32 1.1754944e-38, %v811_v37 }
 0x2c2   :  { %v802_v10 = vsub.f32 1.0, %v801_v4  ;;  %v932_v3 = vmul.f32 %v2030_v56, %v799_v9 }
 0x2c3   :  { %v2082_v11 = vpop.eup %1373  ;;  %v668_v62 = vmul.f32 1.442695, %v637_v8 }
 0x2c4   :  { %v803_v13 = vmul.f32 %v1372_v2, %v802_v10  ;;  %948 = vst [vmem:[#allocation6 + $0x30] sm:$0xff] %v932_v3  ;;  %1113 = vmatmul.f32.gmra.mxu1 %v932_v3  ;;  %698 = vadd.xlane.f32.xlu0 %v2082_v11 }
 0x2c5   :  { %1375 = vpow2.f32 %v668_v62 }
 0x2c6   :  { %v804_v22 = vadd.f32 %v1372_v2, %v803_v13 }
 0x2c8   :  { %v808_v14 = vsel %vm807_vm1, %v1372_v2, %v804_v22 }
 0x2c9   :  { %v813_v57 = vsel %vm810_vm2, %v812_v5, %v808_v14 }
 0x2ca   :  { %v933_v56 = vmul.f32 %v2039_v0, %v813_v57 }
 0x2cb   :  { %v2086_v51 = vpop.eup %1375 }
 0x2cc   :  { %949 = vst [vmem:[#allocation6 + $0x38] sm:$0xff] %v933_v56  ;;  %1116 = vmatmul.f32.gmra.mxu1 %v933_v56  ;;  %700 = vadd.xlane.f32.xlu1 %v2086_v51 }
 0x307   :  { %v687_v17 = vpop.xlane.xlu2 %686 }
 0x308   :  { %1377 = vrcp.f32 %v687_v17  ;;  %v825_v24 = vand.u32 2147483648, %v687_v17  ;;  %v823_v49 = vand.u32 2147483647, %v687_v17  ;;  %vm819_vm4 = vweird.f32 %v687_v17 }
 0x30a   :  { %v826_v28 = vor.u32 1.1754944e-38, %v825_v24  ;;  %vm824_vm6 = vcmp.eq.f32.partialorder %v823_v49, 8.507059e+37 }
 0x30e   :  { %v1378_v54 = vpop.eup %1377 }
 0x30f   :  { %v815_v19 = vmul.f32 %v1378_v54, %v687_v17  ;;  %v689_v21 = vpop.xlane.xlu1 %688  ;;  %vm820_vm3 = vweird.f32 %v1378_v54 }
 0x310   :  { %1379 = vrcp.f32 %v689_v21  ;;  %vm821_vm5 = vmor %vm819_vm4, %vm820_vm3  ;;  %v839_v12 = vand.u32 2147483648, %v689_v21  ;;  %v837_v41 = vand.u32 2147483647, %v689_v21  ;;  %vm833_vm8 = vweird.f32 %v689_v21 }
 0x311   :  { %v816_v15 = vsub.f32 1.0, %v815_v19  ;;  %v1096_v23 = vpop.f32.mrf.mxu1 }
 0x312   :  { %v840_v47 = vor.u32 1.1754944e-38, %v839_v12  ;;  %vm838_vm10 = vcmp.eq.f32.partialorder %v837_v41, 8.507059e+37 }
 0x313   :  { %v817_v25 = vmul.f32 %v1378_v54, %v816_v15 }
 0x315   :  { %v818_v27 = vadd.f32 %v1378_v54, %v817_v25 }
 0x316   :  { %v1380_v0 = vpop.eup %1379 }
 0x317   :  { %v829_v30 = vmul.f32 %v1380_v0, %v689_v21  ;;  %v691_v31 = vpop.xlane.xlu2 %690  ;;  %v822_v32 = vsel %vm821_vm5, %v1378_v54, %v818_v27  ;;  %vm834_vm7 = vweird.f32 %v1380_v0 }
 0x318   :  { %1381 = vrcp.f32 %v691_v31  ;;  %v827_v33 = vsel %vm824_vm6, %v826_v28, %v822_v32  ;;  %vm835_vm9 = vmor %vm833_vm8, %vm834_vm7  ;;  %v853_v60 = vand.u32 2147483648, %v691_v31  ;;  %v851_v61 = vand.u32 2147483647, %v691_v31 }
 0x319   :  { %v830_v34 = vsub.f32 1.0, %v829_v30  ;;  %v1099_v20 = vpop.f32.mrf.mxu1  ;;  %v934_v36 = vmul.f32 %v2052_v26, %v827_v33  ;;  %v1148_v26 = vadd.f32 %v1328_v43, %v1096_v23  ;;  %vm847_vm12 = vweird.f32 %v691_v31 }
 0x31a   :  { %v854_v63 = vor.u32 1.1754944e-38, %v853_v60  ;;  %vm852_vm14 = vcmp.eq.f32.partialorder %v851_v61, 8.507059e+37  ;;  %v1149_v8 = vadd.f32 %v1328_v43, %v1099_v20 }
 0x31b   :  { %v831_v39 = vmul.f32 %v1380_v0, %v830_v34  ;;  %950 = vst [vmem:[#allocation6 + $0x40] sm:$0xff] %v934_v36  ;;  %1119 = vmatmul.f32.gmra.mxu1 %v934_v36 }
 0x31d   :  { %v832_v45 = vadd.f32 %v1380_v0, %v831_v39 }
 0x31e   :  { %v1382_v55 = vpop.eup %1381 }
 0x31f   :  { %v843_v46 = vmul.f32 %v1382_v55, %v691_v31  ;;  %v693_v38 = vpop.xlane.xlu0 %692  ;;  %v836_v50 = vsel %vm835_vm9, %v1380_v0, %v832_v45  ;;  %vm848_vm11 = vweird.f32 %v1382_v55 }
 0x320   :  { %1383 = vrcp.f32 %v693_v38  ;;  %v841_v42 = vsel %vm838_vm10, %v840_v47, %v836_v50  ;;  %vm849_vm13 = vmor %vm847_vm12, %vm848_vm11  ;;  %v867_v37 = vand.u32 2147483648, %v693_v38  ;;  %v865_v59 = vand.u32 2147483647, %v693_v38 }
 0x321   :  { %v844_v52 = vsub.f32 1.0, %v843_v46  ;;  %v1102_v53 = vpop.f32.mrf.mxu1  ;;  %v935_v40 = vmul.f32 %v2057_v48, %v841_v42  ;;  %vm861_vm1 = vweird.f32 %v693_v38 }
 0x322   :  { %v1150_v58 = vadd.f32 %v1148_v26, %v1102_v53  ;;  %v868_v14 = vor.u32 1.1754944e-38, %v867_v37  ;;  %vm866_vm3 = vcmp.eq.f32.partialorder %v865_v59, 8.507059e+37 }
 0x323   :  { %v845_v16 = vmul.f32 %v1382_v55, %v844_v52  ;;  %951 = vst [vmem:[#allocation6 + $0x48] sm:$0xff] %v935_v40  ;;  %1122 = vmatmul.f32.gmra.mxu1 %v935_v40 }
 0x325   :  { %v846_v1 = vadd.f32 %v1382_v55, %v845_v16 }
 0x326   :  { %v1384_v2 = vpop.eup %1383 }
 0x327   :  { %v857_v4 = vmul.f32 %v1384_v2, %v693_v38  ;;  %v695_v6 = vpop.xlane.xlu1 %694  ;;  %v850_v44 = vsel %vm849_vm13, %v1382_v55, %v846_v1  ;;  %vm862_vm15 = vweird.f32 %v1384_v2 }
 0x328   :  { %1385 = vrcp.f32 %v695_v6  ;;  %v855_v9 = vsel %vm852_vm14, %v854_v63, %v850_v44  ;;  %vm863_vm2 = vmor %vm861_vm1, %vm862_vm15  ;;  %v881_v24 = vand.u32 2147483648, %v695_v6  ;;  %v879_v25 = vand.u32 2147483647, %v695_v6 }
 0x329   :  { %v858_v48 = vsub.f32 1.0, %v857_v4  ;;  %v1105_v10 = vpop.f32.mrf.mxu1  ;;  %v936_v3 = vmul.f32 %v2062_v7, %v855_v9  ;;  %vm875_vm5 = vweird.f32 %v695_v6 }
 0x32a   :  { %v1151_v62 = vadd.f32 %v1149_v8, %v1105_v10  ;;  %v882_v31 = vor.u32 1.1754944e-38, %v881_v24  ;;  %vm880_vm7 = vcmp.eq.f32.partialorder %v879_v25, 8.507059e+37 }
 0x32b   :  { %v859_v13 = vmul.f32 %v1384_v2, %v858_v48  ;;  %952 = vst [vmem:[#allocation6 + $0x50] sm:$0xff] %v936_v3  ;;  %1125 = vmatmul.f32.gmra.mxu1 %v936_v3 }
 0x32d   :  { %v860_v22 = vadd.f32 %v1384_v2, %v859_v13 }
 0x32e   :  { %v1386_v5 = vpop.eup %1385 }
 0x32f   :  { %v871_v57 = vmul.f32 %v1386_v5, %v695_v6  ;;  %v697_v56 = vpop.xlane.xlu2 %696  ;;  %v864_v17 = vsel %vm863_vm2, %v1384_v2, %v860_v22  ;;  %vm876_vm4 = vweird.f32 %v1386_v5 }
 0x330   :  { %1387 = vrcp.f32 %v697_v56  ;;  %v869_v54 = vsel %vm866_vm3, %v868_v14, %v864_v17  ;;  %vm877_vm6 = vmor %vm875_vm5, %vm876_vm4  ;;  %v895_v12 = vand.u32 2147483648, %v697_v56  ;;  %v893_v39 = vand.u32 2147483647, %v697_v56 }
 0x331   :  { %v872_v19 = vsub.f32 1.0, %v871_v57  ;;  %v1108_v7 = vpop.f32.mrf.mxu1  ;;  %v937_v21 = vmul.f32 %v2067_v18, %v869_v54  ;;  %vm889_vm9 = vweird.f32 %v697_v56 }
 0x332   :  { %v2096_v15 = vadd.f32 %v1150_v58, %v1108_v7  ;;  %v896_v45 = vor.u32 1.1754944e-38, %v895_v12  ;;  %vm894_vm11 = vcmp.eq.f32.partialorder %v893_v39, 8.507059e+37 }
 0x333   :  { %v873_v23 = vmul.f32 %v1386_v5, %v872_v19  ;;  %953 = vst [vmem:[#allocation6 + $0x58] sm:$0xff] %v937_v21  ;;  %1128 = vmatmul.f32.gmra.mxu1 %v937_v21 }
 0x335   :  { %v874_v49 = vadd.f32 %v1386_v5, %v873_v23 }
 0x336   :  { %v1388_v27 = vpop.eup %1387 }
 0x337   :  { %v885_v0 = vmul.f32 %v1388_v27, %v697_v56  ;;  %v699_v28 = vpop.xlane.xlu0 %698  ;;  %v878_v30 = vsel %vm877_vm6, %v1386_v5, %v874_v49  ;;  %vm890_vm8 = vweird.f32 %v1388_v27 }
 0x338   :  { %1389 = vrcp.f32 %v699_v28  ;;  %v883_v33 = vsel %vm880_vm7, %v882_v31, %v878_v30  ;;  %vm891_vm10 = vmor %vm889_vm9, %vm890_vm8  ;;  %v909_v26 = vand.u32 2147483648, %v699_v28  ;;  %v907_v52 = vand.u32 2147483647, %v699_v28 }
 0x339   :  { %v886_v32 = vsub.f32 1.0, %v885_v0  ;;  %v1111_v18 = vpop.f32.mrf.mxu1  ;;  %v938_v20 = vmul.f32 %v2072_v35, %v883_v33  ;;  %vm903_vm13 = vweird.f32 %v699_v28 }
 0x33a   :  { %v2098_v34 = vadd.f32 %v1151_v62, %v1111_v18  ;;  %v910_v58 = vor.u32 1.1754944e-38, %v909_v26  ;;  %vm908_vm15 = vcmp.eq.f32.partialorder %v907_v52, 8.507059e+37 }
 0x33b   :  { %v887_v36 = vmul.f32 %v1388_v27, %v886_v32  ;;  %954 = vst [vmem:[#allocation6 + $0x60] sm:$0xff] %v938_v20  ;;  %1131 = vmatmul.f32.gmra.mxu1 %v938_v20 }
 0x33d   :  { %v888_v41 = vadd.f32 %v1388_v27, %v887_v36 }
 0x33e   :  { %v1390_v43 = vpop.eup %1389 }
 0x33f   :  { %v899_v55 = vmul.f32 %v1390_v43, %v699_v28  ;;  %v701_v47 = vpop.xlane.xlu1 %700  ;;  %v892_v46 = vsel %vm891_vm10, %v1388_v27, %v888_v41  ;;  %vm904_vm12 = vweird.f32 %v1390_v43 }
 0x340   :  { %1391 = vrcp.f32 %v701_v47  ;;  %v897_v50 = vsel %vm894_vm11, %v896_v45, %v892_v46  ;;  %vm905_vm14 = vmor %vm903_vm13, %vm904_vm12  ;;  %v923_v63 = vand.u32 2147483648, %v701_v47  ;;  %vm917_vm2 = vweird.f32 %v701_v47 }
 0x341   :  { %v900_v38 = vsub.f32 1.0, %v899_v55  ;;  %v939_v35 = vmul.f32 %v2077_v29, %v897_v50  ;;  %v921_v29 = vand.u32 2147483647, %v701_v47 }
 0x342   :  { %v924_v44 = vor.u32 1.1754944e-38, %v923_v63 }
 0x343   :  { %v901_v42 = vmul.f32 %v1390_v43, %v900_v38  ;;  %955 = vst [vmem:[#allocation6 + $0x68] sm:$0xff] %v939_v35  ;;  %1134 = vmatmul.f32.gmra.mxu1 %v939_v35  ;;  %vm922_vm4 = vcmp.eq.f32.partialorder %v921_v29, 8.507059e+37 }
 0x345   :  { %v902_v53 = vadd.f32 %v1390_v43, %v901_v42 }
 0x346   :  { %v1392_v40 = vpop.eup %1391 }
 0x347   :  { %v913_v60 = vmul.f32 %v1392_v40, %v701_v47  ;;  %v906_v16 = vsel %vm905_vm14, %v1390_v43, %v902_v53  ;;  %vm918_vm1 = vweird.f32 %v1392_v40 }
 0x348   :  { %v911_v61 = vsel %vm908_vm15, %v910_v58, %v906_v16  ;;  %vm919_vm3 = vmor %vm917_vm2, %vm918_vm1 }
 0x349   :  { %v914_v1 = vsub.f32 1.0, %v913_v60  ;;  %v940_v2 = vmul.f32 %v2082_v11, %v911_v61  ;;  %v1114_v11 = vpop.f32.mrf.mxu1 }
 0x34a   :  { %v1154_v22 = vadd.f32 %v2096_v15, %v1114_v11 }
 0x34b   :  { %v915_v4 = vmul.f32 %v1392_v40, %v914_v1  ;;  %956 = vst [vmem:[#allocation6 + $0x70] sm:$0xff] %v940_v2  ;;  %1137 = vmatmul.f32.gmra.mxu1 %v940_v2 }
 0x34d   :  { %v916_v6 = vadd.f32 %v1392_v40, %v915_v4 }
 0x34f   :  { %v920_v8 = vsel %vm919_vm3, %v1392_v40, %v916_v6 }
 0x350   :  { %v925_v9 = vsel %vm922_vm4, %v924_v44, %v920_v8 }
 0x351   :  { %v941_v48 = vmul.f32 %v2086_v51, %v925_v9  ;;  %v1117_v10 = vpop.f32.mrf.mxu1 }
 0x352   :  { %v1155_v17 = vadd.f32 %v2098_v34, %v1117_v10 }
 0x353   :  { %957 = vst [vmem:[#allocation6 + $0x78] sm:$0xff] %v941_v48  ;;  %1140 = vmatmul.f32.gmra.mxu1 %v941_v48 }
 0x354   :  { %1191 = dma.vmem_to_hbm [thread:$0]  %s1184_s23, 2048, %s1186_s3, [#allocation7], %s1472_s14, %s1472_s14, %s1473_s15  }
 0x398   :  { %v1120_v3 = vpop.f32.mrf.mxu1 }
 0x399   :  { %v1156_v5 = vadd.f32 %v1154_v22, %v1120_v3 }
 0x3a0   :  { %v1123_v62 = vpop.f32.mrf.mxu1 }
 0x3a1   :  { %v1157_v19 = vadd.f32 %v1155_v17, %v1123_v62 }
 0x3a8   :  { %v1126_v37 = vpop.f32.mrf.mxu1 }
 0x3a9   :  { %v1158_v14 = vadd.f32 %v1156_v5, %v1126_v37 }
 0x3b0   :  { %v1129_v51 = vpop.f32.mrf.mxu1 }
 0x3b1   :  { %v1159_v7 = vadd.f32 %v1157_v19, %v1129_v51 }
 0x3b8   :  { %v1132_v13 = vpop.f32.mrf.mxu1 }
 0x3b9   :  { %v1160_v57 = vadd.f32 %v1158_v14, %v1132_v13 }
 0x3c0   :  { %v1135_v59 = vpop.f32.mrf.mxu1 }
 0x3c1   :  { %v1161_v21 = vadd.f32 %v1159_v7, %v1135_v59 }
 0x3c8   :  { %v1138_v56 = vpop.f32.mrf.mxu1 }
 0x3c9   :  { %v1162_v54 = vadd.f32 %v1160_v57, %v1138_v56 }
 0x3cb   :  { %1164 = vst.msk [vmem:[#allocation5] sm:$0xff] %vm73_vm0, %v1162_v54 }
 0x3d0   :  { %v1141_v23 = vpop.f32.mrf.mxu1 }
 0x3d1   :  { %v1163_v15 = vadd.f32 %v1161_v21, %v1141_v23 }
 0x3d3   :  { %1165 = vst.msk [vmem:[#allocation5 + $0x8] sm:$0xff] %vm73_vm0, %v1163_v15 }
 0x3d4   :  { %1178 = dma.vmem_to_hbm [thread:$0]  %s1171_s26, 256, %s1173_s1, [#allocation4], %s1472_s14, %s1472_s14, %s1473_s15  }
 0x3d5   :  { %1467 = dma.done.wait [#allocation4], 256  }
 0x3d6   :  { %1468 = vsyncadd [#allocation4], 4294967040 }
 0x3d7   :  { %1469 = dma.done.wait [#allocation7], 2048  }
 0x3d8   :  { %1470 = vsyncadd [#allocation7], 4294965248 }
 0x3d9   :  { %1200 = vsyncpa [#allocation3], 1 }
 0x3da   :  { %1201 = vsyncpa [#allocation4], 1 }
 0x3db   :  { %1202 = vsyncpa [#allocation7], 1 }

</bundles_post_ra>
